<compile_context>
chip_gen: v6e
topology: v6e:2x2x1
jax: 0.10.0
libtpu: 0.0.40
codegen_flags: <defaults>
</compile_context>

<pallas_src>
import functools

import jax
import jax.numpy as jnp
from jax.experimental import pallas as pl
from jax.experimental.pallas import tpu as pltpu


# ---------------------------------------------------------------------------
# Pallas kernels
# ---------------------------------------------------------------------------
def _residual_gelu_kernel(x_ref, o_ref, *, compute_dtype, approximate):
    """Fused: o = x + fn(x) with fn = GELU (example wrapped sub-module)."""
    x = x_ref[...].astype(compute_dtype)
    o_ref[...] = (x + jax.nn.gelu(x, approximate=approximate)).astype(o_ref.dtype)


def _residual_add_kernel(x_ref, out_ref, o_ref):
    """Generic variant: o = x + out, where out = fn(x) was computed outside."""
    o_ref[...] = x_ref[...] + out_ref[...]


# ---------------------------------------------------------------------------
# Chip-aware configuration
# ---------------------------------------------------------------------------
@functools.lru_cache(maxsize=1)
def _chip_config():
    kind = ""
    try:
        kind = jax.devices()[0].device_kind.lower()
    except Exception:  # pragma: no cover - defensive, keep running
        pass
    if "v7" in kind or "7x" in kind:
        # 64 MiB VMEM / TC, 3.2 TB/s HBM, 2 TCs: keep headroom, feed both cores,
        # bf16-native math is mandatory to stay memory-bound.
        return dict(vmem_limit=48 * 2**20, fused_block=8 * 2**20,
                    generic_block=4 * 2**20, native_bf16=True, min_grid=2)
    if "v6" in kind:
        return dict(vmem_limit=64 * 2**20, fused_block=8 * 2**20,
                    generic_block=6 * 2**20, native_bf16=True, min_grid=1)
    if "v5" in kind and ("lite" in kind or "v5e" in kind):
        # v5e: no bf16 VPU/EUP -> keep the f32 upcast; still memory-bound.
        return dict(vmem_limit=64 * 2**20, fused_block=8 * 2**20,
                    generic_block=6 * 2**20, native_bf16=False, min_grid=1)
    # Unknown / older chip: conservative, safe-everywhere defaults.
    return dict(vmem_limit=32 * 2**20, fused_block=2 * 2**20,
                generic_block=2 * 2**20, native_bf16=False, min_grid=1)


def _compiler_params(cfg):
    return pltpu.CompilerParams(
        dimension_semantics=("parallel",),
        vmem_limit_bytes=cfg["vmem_limit"],
    )


# ---------------------------------------------------------------------------
# Layout planning (no padding, no extra HBM passes)
# ---------------------------------------------------------------------------
def _round_up(n: int, m: int) -> int:
    return ((n + m - 1) // m) * m


def _largest_divisor_leq(m: int, cap: int) -> int:
    for d in range(max(1, min(m, cap)), 0, -1):
        if m % d == 0:
            return d
    return 1


def _plan_layout(x, max_block_bytes: int, max_cols: int, min_grid: int):
    """Pick a zero-copy 2-D view (rows, cols) plus a row-block size.

    Guarantees rows * cols == x.size exactly (so x.reshape is a free bitcast),
    cols is either a multiple of 128 (lane-dense unmasked stores) or the full
    trailing dim, and block_rows is either the full row count or a multiple of
    the dtype's sublane-packing factor.
    """
    n = x.size
    itemsize = x.dtype.itemsize
    sub = max(8, 32 // itemsize)            # 8 f32, 16 bf16, 32 int8
    if n % 128 == 0:
        k = _largest_divisor_leq(n // 128, max(1, max_cols // 128))
        cols = 128 * k
    else:
        # Ragged total size: keep the natural trailing-dim view (no padding;
        # lane stores may be masked, but there are no extra HBM passes).
        cols = x.shape[-1] if x.ndim >= 2 else n
    rows = n // cols

    budget = (max_block_bytes // max(cols * itemsize, 1)) // sub * sub
    budget = max(sub, budget)
    block_rows = rows if rows <= budget else budget

    # Keep both TensorCores busy on multi-core chips (v7x).
    if min_grid > 1 and rows > sub and pl.cdiv(rows, block_rows) < min_grid:
        block_rows = max(sub, _round_up(pl.cdiv(rows, min_grid), sub))

    grid = (pl.cdiv(rows, block_rows),)
    return rows, cols, block_rows, grid


def _compute_dtype(dtype, cfg):
    if dtype == jnp.float32:
        return jnp.float32
    if dtype == jnp.bfloat16 and cfg["native_bf16"]:
        return jnp.bfloat16
    return jnp.float32


# ---------------------------------------------------------------------------
# Wrappers
# ---------------------------------------------------------------------------
def residual_add_fused(x, *, max_block_bytes=None, max_cols=4096, approximate=True):
    """x: any shape (e.g. NCHW).  Returns x + gelu(x) via a single Pallas pass."""
    cfg = _chip_config()
    if max_block_bytes is None:
        max_block_bytes = cfg["fused_block"]
    rows, cols, block_rows, grid = _plan_layout(x, max_block_bytes, max_cols,
                                                cfg["min_grid"])
    x2d = x.reshape(rows, cols)             # free (contiguous) view, no copy

    kernel = functools.partial(
        _residual_gelu_kernel,
        compute_dtype=_compute_dtype(x.dtype, cfg),
        approximate=approximate,
    )
    y2d = pl.pallas_call(
        kernel,
        out_shape=jax.ShapeDtypeStruct((rows, cols), x.dtype),
        grid=grid,
        in_specs=[pl.BlockSpec((block_rows, cols), lambda i: (i, 0))],
        out_specs=pl.BlockSpec((block_rows, cols), lambda i: (i, 0)),
        compiler_params=_compiler_params(cfg),
    )(x2d)
    return y2d.reshape(x.shape)


def residual_add(x, out, *, max_block_bytes=None, max_cols=4096):
    """Generic ResidualAdd: returns x + out (out = fn(x) computed elsewhere).

    `out` is a dead temporary per PyTorch semantics, so it is aliased to the
    kernel output (pays off under jit with donation).
    """
    assert x.shape == out.shape and x.dtype == out.dtype
    cfg = _chip_config()
    if max_block_bytes is None:
        max_block_bytes = cfg["generic_block"]
    rows, cols, block_rows, grid = _plan_layout(x, max_block_bytes, max_cols,
                                                cfg["min_grid"])
    x2d = x.reshape(rows, cols)
    o2d = out.reshape(rows, cols)

    y2d = pl.pallas_call(
        _residual_add_kernel,
        out_shape=jax.ShapeDtypeStruct((rows, cols), x.dtype),
        grid=grid,
        in_specs=[
            pl.BlockSpec((block_rows, cols), lambda i: (i, 0)),
            pl.BlockSpec((block_rows, cols), lambda i: (i, 0)),
        ],
        out_specs=pl.BlockSpec((block_rows, cols), lambda i: (i, 0)),
        input_output_aliases={1: 0},        # reuse `out`'s buffer for the result
        compiler_params=_compiler_params(cfg),
    )(x2d, o2d)
    return y2d.reshape(x.shape)


# ---------------------------------------------------------------------------
# Demo / self-check
# ---------------------------------------------------------------------------
if __name__ == "__main__":
    key = jax.random.PRNGKey(0)
    # NCHW like the PyTorch module would see: batch=2, channels=4, 16x16 spatial.
    x = jax.random.normal(key, (2, 4, 16, 16), dtype=jnp.float32)

    # Fused path: y = x + fn(x), fn = GELU, computed inside the kernel.
    y_fused = jax.block_until_ready(residual_add_fused(x))
    ref = x + jax.nn.gelu(x, approximate=True)
    assert y_fused.shape == x.shape and y_fused.dtype == x.dtype
    assert jnp.allclose(y_fused, ref, atol=1e-5, rtol=1e-5)

    # Generic path: fn(x) computed in plain JAX, residual add in the kernel.
    out = jax.nn.gelu(x, approximate=True)
    ref_generic = x + out                   # computed before `out` is donated
    residual_add_jit = jax.jit(residual_add, donate_argnums=(1,))
    y_generic = jax.block_until_ready(residual_add_jit(x, out))
    assert y_generic.shape == x.shape and y_generic.dtype == x.dtype
    assert jnp.allclose(y_generic, ref_generic, atol=1e-5, rtol=1e-5)

    # Multi-block grid + ragged last block, no wrapper-side padding or slicing.
    x2 = jax.random.normal(jax.random.PRNGKey(1), (2, 8, 24, 56), dtype=jnp.float32)
    y2 = jax.block_until_ready(
        residual_add_fused(x2, max_block_bytes=64 * 1024, max_cols=256)
    )
    assert jnp.allclose(y2, x2 + jax.nn.gelu(x2, approximate=True),
                        atol=1e-5, rtol=1e-5)

    # Fallback path: total element count not a multiple of 128.
    x3 = jax.random.normal(jax.random.PRNGKey(2), (1, 3, 5, 7), dtype=jnp.float32)
    y3 = jax.block_until_ready(residual_add_fused(x3))
    assert jnp.allclose(y3, x3 + jax.nn.gelu(x3, approximate=True),
                        atol=1e-5, rtol=1e-5)

    # bf16 path (native bf16 GELU on v6e/v7x, f32 upcast on v5e / unknown).
    x4 = jax.random.normal(jax.random.PRNGKey(3), (2, 4, 16, 16), dtype=jnp.bfloat16)
    y4 = jax.block_until_ready(residual_add_fused(x4))
    ref4 = (x4.astype(jnp.float32)
            + jax.nn.gelu(x4.astype(jnp.float32), approximate=True)
            ).astype(jnp.bfloat16)
    assert y4.dtype == jnp.bfloat16
    assert jnp.allclose(y4.astype(jnp.float32), ref4.astype(jnp.float32),
                        atol=5e-2, rtol=5e-2)

    print("KERNEL_OK")
</pallas_src>

<mosaic_0001>
module attributes {stable_mosaic.version = 11 : i64} {
  func.func @_residual_gelu_kernel(%arg0: i32, %arg1: memref<1x2048xf32, #tpu.memory_space<vmem>>, %arg2: memref<1x2048xf32, #tpu.memory_space<vmem>>) attributes {dimension_semantics = [#tpu.dimension_semantics<parallel>], iteration_bounds = array<i64: 1>, scalar_prefetch = 0 : i64, scratch_operands = 0 : i64, tpu.core_type = #tpu.core_type<tc>, window_params = [{transform_indices = @transform_0, window_bounds = array<i64: 1, 2048>}, {transform_indices = @transform_1, window_bounds = array<i64: 1, 2048>}]} {
    %c0 = arith.constant 0 : index
    %c0_0 = arith.constant 0 : index
    %0 = vector.load %arg1[%c0, %c0_0] : memref<1x2048xf32, #tpu.memory_space<vmem>>, vector<1x2048xf32>
    %1 = arith.mulf %0, %0 : vector<1x2048xf32>
    %2 = arith.mulf %0, %1 : vector<1x2048xf32>
    %cst = arith.constant 4.471500e-02 : f32
    %3 = vector.broadcast %cst : f32 to vector<1x2048xf32>
    %4 = arith.mulf %3, %2 : vector<1x2048xf32>
    %5 = arith.addf %0, %4 : vector<1x2048xf32>
    %cst_1 = arith.constant 0.797884583 : f32
    %6 = vector.broadcast %cst_1 : f32 to vector<1x2048xf32>
    %7 = arith.mulf %6, %5 : vector<1x2048xf32>
    %8 = math.tanh %7 : vector<1x2048xf32>
    %cst_2 = arith.constant 1.000000e+00 : f32
    %9 = vector.broadcast %cst_2 : f32 to vector<1x2048xf32>
    %10 = arith.addf %9, %8 : vector<1x2048xf32>
    %cst_3 = arith.constant 5.000000e-01 : f32
    %11 = vector.broadcast %cst_3 : f32 to vector<1x2048xf32>
    %12 = arith.mulf %11, %10 : vector<1x2048xf32>
    %13 = arith.mulf %0, %12 : vector<1x2048xf32>
    %14 = arith.addf %0, %13 : vector<1x2048xf32>
    %c0_4 = arith.constant 0 : index
    %c0_5 = arith.constant 0 : index
    %15 = vector.load %arg2[%c0_4, %c0_5] : memref<1x2048xf32, #tpu.memory_space<vmem>>, vector<1x2048xf32>
    tpu.vector_store %arg2[%c0_4, %c0_5], %14 {strides = array<i32>} : memref<1x2048xf32, #tpu.memory_space<vmem>>, vector<1x2048xf32>,
    return
  }
  func.func @transform_0(%arg0: i32) -> (i32, i32) {
    %c0_i32 = arith.constant 0 : i32
    %c0_i32_0 = arith.constant 0 : i32
    return %arg0, %c0_i32 : i32, i32
  }
  func.func @transform_1(%arg0: i32) -> (i32, i32) {
    %c0_i32 = arith.constant 0 : i32
    %c0_i32_0 = arith.constant 0 : i32
    return %arg0, %c0_i32 : i32, i32
  }
}

</mosaic_0001>

<bundles_post_ra>
// kernel: tpu_custom_call.1
= control target key start
LH: loop header
LB: loop body
LE: loop exit
PB: predicated region body
PF: predicated region fallthrough
CT: control target
= control target key end

     0   :  { %6 = vsyncpa [#allocation3], 0  ;;  %s128_s0 = inlined_call_operand.hbm [shape: f32[1,2048], index: 0, kind: input, shape index: {}]   ;;  %s129_s1 = inlined_call_operand.hbm [shape: f32[1,2048], index: 1, kind: output, shape index: {}]  }
   0x1   :  { %7 = vsyncpa [#allocation4], 0  ;;  %s110_s6 = smov [#allocation2]  }
   0x2   :  { %s14_s7 = sshll.u32 %s110_s6, 4  ;;  %s15_s7 = int_to_ptr.vmem [resolvable:$true] %s14_s7 }
   0x3   :  { %s74_s8 = scalar_lea.vmem %s15_s7, 256  ;;  %p79_p1 = scmp.lt.s32.totalorder %s15_s7, %s15_s7 }
   0x4   :  { %p75_p0 = scmp.ne.s32.totalorder %s15_s7, %s74_s8  ;;  %p80_p2 = scmp.lt.s32.totalorder %s74_s8, %s74_s8 }
   0x6   :  { %p81_p3 = por %p80_p2, %p79_p1 }
   0x8   :  { %p82_p4 = pnand %p81_p3, %p75_p0 }
   0xa   :  { %85 = shalt.err (!%p82_p4)
}
   0xb   :  { %17 = dma.hbm_to_vmem [thread:$0]  %s128_s0, 256, %s15_s7, [#allocation3]  }
   0xc   :  { %106 = dma.done.wait [#allocation3], 256  }
   0xd   :  { %107 = vsyncadd [#allocation3], 4294967040  ;;  %v21_v0 = vld [vmem:[#allocation2] sm:$0xff]  ;;  %v22_v1 = vld [vmem:[#allocation2 + $0x8] sm:$0xff]  ;;  %s111_s0 = smov [#allocation5]  }
   0xe   :  { %v23_v2 = vmul.f32 %v21_v0, %v21_v0  ;;  %v24_v3 = vmul.f32 %v22_v1, %v22_v1  ;;  %s51_s11 = sshll.u32 %s111_s0, 4  ;;  %s52_s11 = int_to_ptr.vmem [resolvable:$true] %s51_s11 }
   0xf   :  { %s86_s12 = scalar_lea.vmem %s52_s11, 256  ;;  %p91_p6 = scmp.lt.s32.totalorder %s52_s11, %s52_s11 }
  0x10   :  { %v25_v4 = vmul.f32 %v23_v2, %v21_v0  ;;  %v26_v5 = vmul.f32 %v24_v3, %v22_v1  ;;  %p87_p5 = scmp.ne.s32.totalorder %s52_s11, %s86_s12  ;;  %p92_p7 = scmp.lt.s32.totalorder %s86_s12, %s86_s12 }
  0x12   :  { %v27_v6 = vmul.f32 0.044715, %v25_v4  ;;  %v28_v7 = vmul.f32 0.044715, %v26_v5  ;;  %p93_p8 = por %p92_p7, %p91_p6 }
  0x14   :  { %v29_v8 = vadd.f32 %v27_v6, %v21_v0  ;;  %v30_v9 = vadd.f32 %v28_v7, %v22_v1  ;;  %p94_p9 = pnand %p93_p8, %p87_p5 }
  0x16   :  { %v31_v10 = vmul.f32 0.7978846, %v29_v8  ;;  %v32_v11 = vmul.f32 0.7978846, %v30_v9 }
  0x18   :  { %62 = vtanh.f32 %v31_v10 }
  0x19   :  { %64 = vtanh.f32 %v32_v11 }
  0x25   :  { %v63_v12 = vpop.eup %62 }
  0x26   :  { %v65_v13 = vpop.eup %64  ;;  %v35_v14 = vadd.f32 1.0, %v63_v12 }
  0x27   :  { %v36_v15 = vadd.f32 1.0, %v65_v13 }
  0x28   :  { %v37_v16 = vmul.f32 0.5, %v35_v14 }
  0x29   :  { %v38_v17 = vmul.f32 0.5, %v36_v15 }
  0x2a   :  { %v39_v18 = vmul.f32 %v37_v16, %v21_v0 }
  0x2b   :  { %v40_v19 = vmul.f32 %v38_v17, %v22_v1 }
  0x2c   :  { %v41_v20 = vadd.f32 %v39_v18, %v21_v0 }
  0x2d   :  { %v42_v21 = vadd.f32 %v40_v19, %v22_v1 }
  0x2e   :  { %43 = vst [vmem:[#allocation5] sm:$0xff] %v41_v20 }
  0x2f   :  { %44 = vst [vmem:[#allocation5 + $0x8] sm:$0xff] %v42_v21 }
  0x30   :  { %97 = shalt.err (!%p94_p9)
}
  0x31   :  { %54 = dma.vmem_to_hbm [thread:$0]  %s52_s11, 256, %s129_s1, [#allocation4]  }
  0x32   :  { %108 = dma.done.wait [#allocation4], 256  }
  0x33   :  { %109 = vsyncadd [#allocation4], 4294967040 }
  0x34   :  { %58 = vsyncpa [#allocation3], 1 }
  0x35   :  { %59 = vsyncpa [#allocation4], 1 }

</bundles_post_ra>
